<compile_context>
chip_gen: v6e
topology: v6e:2x2x1
jax: 0.10.0
libtpu: 0.0.40
codegen_flags: <defaults>
</compile_context>

<pallas_src>
import jax
import jax.numpy as jnp
from jax.experimental import pallas as pl
from jax.experimental.pallas import tpu as pltpu

# Split big copies into a handful of concurrent DMAs (one per leading-axis chunk).
_MAX_DMA_CHUNKS = 4
_CHUNK_THRESHOLD_BYTES = 8 * 1024 * 1024  # below this a single DMA is plenty


def _make_dma_copy_kernel(splits):
    """Build a kernel copying x_ref -> o_ref (both HBM / pl.ANY) via async DMAs.

    `splits` is either None (single full-array DMA) or a tuple of static
    (start, size) slices along axis 0, one DMA per slice.
    """
    n_sems = 1 if splits is None else len(splits)

    def kernel(x_ref, o_ref, sem):
        copies = []
        if splits is None:
            copies.append(pltpu.make_async_copy(x_ref, o_ref, sem.at[0]))
        else:
            for i, (start, size) in enumerate(splits):
                copies.append(
                    pltpu.make_async_copy(
                        x_ref.at[pl.ds(start, size)],
                        o_ref.at[pl.ds(start, size)],
                        sem.at[i],
                    )
                )
        # Issue every DMA first, then wait on all of them (max overlap).
        for cp in copies:
            cp.start()
        for cp in copies:
            cp.wait()

    return kernel, n_sems


def _hbm_to_hbm_copy(x, *, max_chunks=_MAX_DMA_CHUNKS,
                     chunk_threshold_bytes=_CHUNK_THRESHOLD_BYTES):
    """Bit-exact copy of `x` into a fresh HBM buffer via DMA (no VMEM staging)."""
    itemsize = jnp.dtype(x.dtype).itemsize
    nbytes = x.size * itemsize

    # Decide how many concurrent DMAs to issue (static, trace-time decision).
    splits = None
    if (x.ndim >= 1 and x.shape[0] >= 2 and max_chunks > 1
            and nbytes >= chunk_threshold_bytes):
        n = min(max_chunks, x.shape[0])
        base, rem = divmod(x.shape[0], n)
        splits, start = [], 0
        for i in range(n):
            size = base + (1 if i < rem else 0)
            splits.append((start, size))
            start += size
        splits = tuple(splits)

    kernel, n_sems = _make_dma_copy_kernel(splits)

    return pl.pallas_call(
        kernel,
        out_shape=jax.ShapeDtypeStruct(x.shape, x.dtype),
        in_specs=[pl.BlockSpec(memory_space=pl.ANY)],    # raw HBM ref, no auto-DMA
        out_specs=pl.BlockSpec(memory_space=pl.ANY),     # raw HBM ref, no auto-DMA
        scratch_shapes=[pltpu.SemaphoreType.DMA((n_sems,))],
        cost_estimate=pl.CostEstimate(
            flops=0,
            transcendentals=0,
            bytes_accessed=2 * nbytes,
        ),
    )(x)


def identical_forward(x, *, materialize=False):
    """Identity forward (== Identical.forward).

    materialize=False (default): exact nn.Module semantics — returns `x` itself.
        Zero HBM traffic, no kernel launch (the review's top win).
    materialize=True: returns a bit-exact copy in a distinct buffer, produced by
        an HBM->HBM DMA inside a Pallas kernel. Works for any shape/dtype
        (including ragged element counts) with 2N bytes of HBM traffic total.
    """
    if not materialize or x.size == 0:
        return x
    return _hbm_to_hbm_copy(x)


if __name__ == "__main__":
    key = jax.random.PRNGKey(0)

    # Small NCHW-style input consistent with the retrieval model.
    x = jax.random.normal(key, (2, 4, 16, 16), dtype=jnp.float32)

    # Default path: pure identity, no kernel.
    y0 = identical_forward(x)
    assert y0 is x

    # Kernel path: distinct buffer via a single HBM->HBM DMA.
    y = identical_forward(x, materialize=True)
    jax.block_until_ready(y)
    assert y.shape == x.shape and y.dtype == x.dtype
    assert bool(jnp.all(y == x))

    # Ragged shape (element count not a multiple of 128): DMA needs no padding.
    x_odd = jax.random.normal(jax.random.PRNGKey(1), (3, 5, 7), dtype=jnp.float32)
    y_odd = identical_forward(x_odd, materialize=True)
    jax.block_until_ready(y_odd)
    assert y_odd.shape == x_odd.shape and y_odd.dtype == x_odd.dtype
    assert bool(jnp.all(y_odd == x_odd))

    # bf16 sanity check (sub-32-bit dtype).
    x_bf16 = jax.random.normal(jax.random.PRNGKey(2), (4, 8, 32), dtype=jnp.bfloat16)
    y_bf16 = identical_forward(x_bf16, materialize=True)
    jax.block_until_ready(y_bf16)
    assert y_bf16.shape == x_bf16.shape and y_bf16.dtype == x_bf16.dtype
    assert bool(jnp.all(y_bf16 == x_bf16))

    # Exercise the chunked multi-DMA path (forced on a small array for testing).
    x_big = jax.random.normal(jax.random.PRNGKey(3), (64, 128), dtype=jnp.float32)
    y_big = _hbm_to_hbm_copy(x_big, max_chunks=4, chunk_threshold_bytes=0)
    jax.block_until_ready(y_big)
    assert bool(jnp.all(y_big == x_big))

    print("KERNEL_OK")
</pallas_src>

<mosaic_0001>
module attributes {stable_mosaic.version = 11 : i64} {
  func.func @kernel(%arg0: memref<2x4x16x16xf32, #tpu.memory_space<any>>, %arg1: memref<2x4x16x16xf32, #tpu.memory_space<any>>, %arg2: memref<1x!tpu.dma_semaphore, #tpu.memory_space<semaphore_mem>>) attributes {dimension_semantics = [], scalar_prefetch = 0 : i64, scratch_operands = 1 : i64, tpu.core_type = #tpu.core_type<tc>} {
    %c0_i32 = arith.constant 0 : i32
    %0 = tpu.memref_slice %arg2[%c0_i32] : memref<1x!tpu.dma_semaphore, #tpu.memory_space<semaphore_mem>> -> memref<1x!tpu.dma_semaphore, #tpu.memory_space<semaphore_mem>>
    %1 = tpu.memref_squeeze %0 : memref<1x!tpu.dma_semaphore, #tpu.memory_space<semaphore_mem>> -> memref<!tpu.dma_semaphore, #tpu.memory_space<semaphore_mem>>
    tpu.enqueue_dma source(%arg0 : memref<2x4x16x16xf32, #tpu.memory_space<any>>) target(%arg1 : memref<2x4x16x16xf32, #tpu.memory_space<any>>) target_semaphore(%1 : memref<!tpu.dma_semaphore, #tpu.memory_space<semaphore_mem>>)
    %c0_i32_0 = arith.constant 0 : i32
    %2 = tpu.memref_slice %arg2[%c0_i32_0] : memref<1x!tpu.dma_semaphore, #tpu.memory_space<semaphore_mem>> -> memref<1x!tpu.dma_semaphore, #tpu.memory_space<semaphore_mem>>
    %3 = tpu.memref_squeeze %2 : memref<1x!tpu.dma_semaphore, #tpu.memory_space<semaphore_mem>> -> memref<!tpu.dma_semaphore, #tpu.memory_space<semaphore_mem>>
    tpu.wait_dma2 semaphore(%3 : memref<!tpu.dma_semaphore, #tpu.memory_space<semaphore_mem>>) src(%arg0 : memref<2x4x16x16xf32, #tpu.memory_space<any>>) dst(%arg1 : memref<2x4x16x16xf32, #tpu.memory_space<any>>)
    return
  }
}

</mosaic_0001>

<bundles_post_ra>
// kernel: tpu_custom_call.1
= control target key start
LH: loop header
LB: loop body
LE: loop exit
PB: predicated region body
PF: predicated region fallthrough
CT: control target
= control target key end

     0   :  { %s30_s6 = smov [#allocation2]   ;;  %s31_s7 = smov 131072   ;;  %s49_s0 = inlined_call_operand.hbm [shape: f32[2,4,16,16], index: 0, kind: input, shape index: {}]   ;;  %s50_s1 = inlined_call_operand.hbm [shape: f32[2,4,16,16], index: 1, kind: output, shape index: {}]  }
   0x1   :  { %s32_s8 = smov 0  }
   0x2   :  { %12 = dma.general %s49_s0, 2048, %s50_s1, %s30_s6, %s31_s7, [#allocation4], %s32_s8, 0  }
   0x3   :  { %28 = dma.done.wait [#allocation2], 2048 }
   0x4   :  { %29 = vsyncadd [#allocation2], 4294965248 }
   0x5   :  { %18 = vsyncmov [#allocation2] }
   0x8   :  { %s19_s13 = vpop.sfrf %18 }
   0x9   :  { %p24_p0 = scmp.ne.s32.totalorder %s19_s13, 0 }
   0xb   :  { %23 = shalt.err (%p24_p0)  }

</bundles_post_ra>
